<compile_context>
chip_gen: v5e
topology: v5e:2x2
jax: 0.10.0
libtpu: 0.0.40
codegen_flags: <defaults>
</compile_context>

<pallas_src>
import math
from functools import partial

import jax
import jax.numpy as jnp
from jax.experimental import pallas as pl
from jax.experimental.pallas import tpu as pltpu

_SQRT_2_OVER_PI = math.sqrt(2.0 / math.pi)


def _gelu_tanh(x):
    # Matches torch.nn.GELU(approximate='tanh')
    return 0.5 * x * (1.0 + jnp.tanh(_SQRT_2_OVER_PI * (x + 0.044715 * x * x * x)))


def _round_up(x, m):
    return (x + m - 1) // m * m


def _cdiv(a, b):
    return -(-a // b)


def _physical_vmem_bytes():
    try:
        return int(pltpu.get_tpu_info().vmem_capacity_bytes)
    except Exception:
        return 128 * 1024 * 1024  # v5e/v6e default


def mlp_kernel(x_ref, w1_ref, b1_ref, w2_ref, b2_ref, o_ref, acc_ref, *, gelu_chunk):
    # Grid: (token tiles, hidden tiles). The hidden axis is the reduction axis
    # of the second matmul, accumulated in f32 VMEM scratch.
    k = pl.program_id(1)

    @pl.when(k == 0)
    def _():
        acc_ref[...] = jnp.zeros_like(acc_ref)

    x = x_ref[...]
    th = w1_ref.shape[1]
    # Static sub-chunking of the hidden dim bounds the live f32 GELU
    # intermediate to (tm x gelu_chunk) while the full weight tile stays
    # resident in VMEM.  GELU is elementwise over hidden, so chunks are
    # independent and simply accumulate into acc_ref.
    for c0 in range(0, th, gelu_chunk):
        c1 = min(c0 + gelu_chunk, th)
        h = jnp.dot(x, w1_ref[:, c0:c1], preferred_element_type=jnp.float32)
        h = _gelu_tanh(h + b1_ref[:, c0:c1])          # f32 VPU + EUP tanh
        acc_ref[...] += jnp.dot(h.astype(w2_ref.dtype), w2_ref[c0:c1, :],
                                preferred_element_type=jnp.float32)

    @pl.when(k == pl.num_programs(1) - 1)
    def _():
        o_ref[...] = (acc_ref[...] + b2_ref[...]).astype(o_ref.dtype)


@partial(jax.jit, static_argnames=("tile_m", "gelu_chunk"))
def mlp_forward(x, w1, b1, w2, b2, *, tile_m=None, gelu_chunk=512):
    """Fused GPT-2 MLP forward.

    x:  (B, T, D)
    w1: (D, H)  c_fc weight, pre-transposed to (in, out) layout
    b1: (H,)
    w2: (H, D)  c_proj weight, pre-transposed to (in, out) layout
    b2: (D,)
    """
    B, T, D = x.shape
    Dw, H = w1.shape
    assert Dw == D and w2.shape == (H, D) and b1.shape == (H,) and b2.shape == (D,)
    M = B * T

    x_itemsize = jnp.dtype(x.dtype).itemsize
    w_itemsize = jnp.dtype(w1.dtype).itemsize

    # ---- generation-aware VMEM budget ---------------------------------------
    phys_vmem = _physical_vmem_bytes()
    vmem_cap = max(32 * 1024 * 1024, int(phys_vmem * 0.75))   # ~96 MiB v5e/v6e, ~48 MiB v7x
    if tile_m is None:
        tile_m = 512 if phys_vmem >= 96 * 1024 * 1024 else 256

    # ---- sublane/lane alignment ----------------------------------------------
    sub = {1: 32, 2: 16}.get(x_itemsize, 8)          # sublane packing minimum

    tm = max(sub, (min(tile_m, _round_up(M, sub)) // sub) * sub)
    # Megacore: make sure the "parallel" token axis has >= 2 tiles when it can,
    # so both v7x TensorCores get work (harmless on v5e/v6e).
    if M > sub and _cdiv(M, tm) < 2:
        tm = max(sub, _round_up(_cdiv(M, 2), sub))
    M_pad = _round_up(M, tm)
    n_m = M_pad // tm

    D_pad = _round_up(D, 128)                         # lane-dense in/out
    H_pad = _round_up(H, 128)

    # ---- hidden tile selection (prefer fully-resident weights) ---------------
    def _footprint_bytes(tm_, th_):
        wb = 2 * 2 * D_pad * th_ * w_itemsize         # w1 + w2 tiles, double-buffered
        xb = 2 * tm_ * D_pad * x_itemsize             # x tiles, double-buffered
        ob = 2 * tm_ * D_pad * x_itemsize             # out tiles, double-buffered
        ab = tm_ * D_pad * 4                          # f32 accumulator scratch
        hb = 2 * tm_ * min(gelu_chunk, th_) * 4       # live GELU intermediate (+slack)
        bb = 2 * 2 * (th_ + D_pad) * 4                # biases (f32, double-buffered)
        return wb + xb + ob + ab + hb + bb

    n_h = 1
    th = H_pad
    while _footprint_bytes(tm, th) > vmem_cap and th > 128:
        n_h += 1
        th = _round_up(_cdiv(H_pad, n_h), 128)
    H_full = n_h * th                                  # >= H_pad, multiple of th

    # ---- pad operands (all pads are no-ops at real GPT-2 sizes) --------------
    x2 = jnp.pad(x.reshape(M, D), ((0, M_pad - M), (0, D_pad - D)))
    w1p = jnp.pad(w1, ((0, D_pad - D), (0, H_full - H)))
    w2p = jnp.pad(w2, ((0, H_full - H), (0, D_pad - D)))
    b1p = jnp.pad(b1.astype(jnp.float32), (0, H_full - H)).reshape(1, H_full)
    b2p = jnp.pad(b2.astype(jnp.float32), (0, D_pad - D)).reshape(1, D_pad)

    # ---- cost estimate for the XLA scheduler ----------------------------------
    w_reads = 1 if n_h == 1 else n_m                   # weights re-streamed per token tile
    cost = pl.CostEstimate(
        flops=4 * M_pad * D_pad * H_full,
        transcendentals=M_pad * H_full,
        bytes_accessed=(M_pad * D_pad * x_itemsize                       # x read
                        + w_reads * 2 * D_pad * H_full * w_itemsize      # w1 + w2
                        + M_pad * D_pad * x_itemsize),                   # out write
    )

    out = pl.pallas_call(
        partial(mlp_kernel, gelu_chunk=gelu_chunk),
        out_shape=jax.ShapeDtypeStruct((M_pad, D_pad), x.dtype),
        grid_spec=pltpu.PrefetchScalarGridSpec(
            num_scalar_prefetch=0,
            grid=(n_m, n_h),
            in_specs=[
                pl.BlockSpec((tm, D_pad), lambda i, k: (i, 0)),
                pl.BlockSpec((D_pad, th), lambda i, k: (0, k)),
                pl.BlockSpec((1, th),     lambda i, k: (0, k)),
                pl.BlockSpec((th, D_pad), lambda i, k: (k, 0)),
                pl.BlockSpec((1, D_pad),  lambda i, k: (0, 0)),
            ],
            out_specs=pl.BlockSpec((tm, D_pad), lambda i, k: (i, 0)),
            scratch_shapes=[pltpu.VMEM((tm, D_pad), jnp.float32)],
        ),
        compiler_params=pltpu.CompilerParams(
            dimension_semantics=("parallel", "arbitrary"),
            vmem_limit_bytes=int(vmem_cap),
        ),
        cost_estimate=cost,
    )(x2, w1p, b1p, w2p, b2p)

    return out[:M, :D].reshape(B, T, D)


def reference_mlp(x, w_fc, b_fc, w_proj, b_proj):
    # Torch-layout reference: y = (gelu(x @ w_fc.T + b_fc)) @ w_proj.T + b_proj
    h = jnp.einsum("btd,hd->bth", x, w_fc) + b_fc
    h = _gelu_tanh(h)
    return jnp.einsum("bth,dh->btd", h, w_proj) + b_proj


if __name__ == "__main__":
    # Small config: n_embd = 32, n_mlp = 32 -> hidden = 4 * n_mlp = 128
    B, T, n_embd, n_mlp = 2, 8, 32, 32
    H = 4 * n_mlp

    key = jax.random.PRNGKey(0)
    kx, k1, k2, k3, k4 = jax.random.split(key, 5)

    x = jax.random.normal(kx, (B, T, n_embd), dtype=jnp.float32)
    # Torch weight layout (out, in), deterministic scaled-normal init.
    w_fc = jax.random.normal(k1, (H, n_embd), dtype=jnp.float32) * 0.02
    b_fc = jax.random.normal(k2, (H,), dtype=jnp.float32) * 0.02
    w_proj = jax.random.normal(k3, (n_embd, H), dtype=jnp.float32) * 0.02
    b_proj = jax.random.normal(k4, (n_embd,), dtype=jnp.float32) * 0.02

    # One-time transpose to (in, out) layout, OUTSIDE the jitted hot path.
    w1 = jnp.asarray(w_fc.T)     # (D, H)
    w2 = jnp.asarray(w_proj.T)   # (H, D)

    # --- f32 correctness check ------------------------------------------------
    y = mlp_forward(x, w1, b_fc, w2, b_proj)
    jax.block_until_ready(y)
    y_ref = reference_mlp(x, w_fc, b_fc, w_proj, b_proj)
    assert y.shape == (B, T, n_embd)
    assert jnp.allclose(y, y_ref, atol=2e-5, rtol=2e-5)

    # --- bf16 path smoke check (doubles MXU rate, halves VMEM/HBM traffic) ----
    y_bf16 = mlp_forward(x.astype(jnp.bfloat16), w1.astype(jnp.bfloat16), b_fc,
                         w2.astype(jnp.bfloat16), b_proj)
    jax.block_until_ready(y_bf16)
    assert jnp.allclose(y_bf16.astype(jnp.float32), y_ref, atol=1e-2, rtol=1e-2)

    print("KERNEL_OK")
</pallas_src>

<mosaic_0001>
module attributes {stable_mosaic.version = 11 : i64} {
  func.func @mlp_kernel(%arg0: i32, %arg1: i32, %arg2: memref<8x128xf32, #tpu.memory_space<vmem>>, %arg3: memref<128x128xf32, #tpu.memory_space<vmem>>, %arg4: memref<1x128xf32, #tpu.memory_space<vmem>>, %arg5: memref<128x128xf32, #tpu.memory_space<vmem>>, %arg6: memref<1x128xf32, #tpu.memory_space<vmem>>, %arg7: memref<8x128xf32, #tpu.memory_space<vmem>>, %arg8: memref<8x128xf32, #tpu.memory_space<vmem>>) attributes {dimension_semantics = [#tpu.dimension_semantics<parallel>, #tpu.dimension_semantics<arbitrary>], iteration_bounds = array<i64: 2, 1>, scalar_prefetch = 0 : i64, scratch_operands = 1 : i64, tpu.core_type = #tpu.core_type<tc>, window_params = [{transform_indices = @transform_0, window_bounds = array<i64: 8, 128>}, {transform_indices = @transform_1, window_bounds = array<i64: 128, 128>}, {transform_indices = @transform_2, window_bounds = array<i64: 1, 128>}, {transform_indices = @transform_3, window_bounds = array<i64: 128, 128>}, {pipeline_mode = #tpu.pipeline_mode<synchronous>, transform_indices = @transform_4, window_bounds = array<i64: 1, 128>}, {transform_indices = @transform_5, window_bounds = array<i64: 8, 128>}]} {
    %c0_i32 = arith.constant 0 : i32
    %0 = arith.cmpi eq, %arg1, %c0_i32 : i32
    %1 = arith.extui %0 : i1 to i32
    %c0_i32_0 = arith.constant 0 : i32
    %2 = arith.cmpi ne, %1, %c0_i32_0 : i32
    scf.if %2 {
      %cst_19 = arith.constant 0.000000e+00 : f32
      %30 = vector.broadcast %cst_19 : f32 to vector<8x128xf32>
      %c0_20 = arith.constant 0 : index
      %c0_21 = arith.constant 0 : index
      %31 = vector.load %arg8[%c0_20, %c0_21] : memref<8x128xf32, #tpu.memory_space<vmem>>, vector<8x128xf32>
      tpu.vector_store %arg8[%c0_20, %c0_21], %30 {strides = array<i32>} : memref<8x128xf32, #tpu.memory_space<vmem>>, vector<8x128xf32>,
    } else {
    }
    %c0 = arith.constant 0 : index
    %c0_1 = arith.constant 0 : index
    %3 = vector.load %arg2[%c0, %c0_1] : memref<8x128xf32, #tpu.memory_space<vmem>>, vector<8x128xf32>
    %c0_2 = arith.constant 0 : index
    %c0_3 = arith.constant 0 : index
    %4 = vector.load %arg3[%c0_2, %c0_3] : memref<128x128xf32, #tpu.memory_space<vmem>>, vector<128x128xf32>
    %cst = arith.constant dense<0.000000e+00> : vector<8x128xf32>
    %5 = tpu.matmul %3, %4, %cst {dimension_numbers = #tpu.dot_dimension_numbers<[1], [0], [0], [1], [0, 0, 1, 1], [], []>} : vector<8x128xf32>, vector<128x128xf32>, vector<8x128xf32> -> vector<8x128xf32>
    %c0_4 = arith.constant 0 : index
    %c0_5 = arith.constant 0 : index
    %6 = vector.load %arg4[%c0_4, %c0_5] : memref<1x128xf32, #tpu.memory_space<vmem>>, vector<1x128xf32>
    %7 = vector.broadcast %6 : vector<1x128xf32> to vector<8x128xf32>
    %8 = arith.addf %5, %7 : vector<8x128xf32>
    %cst_6 = arith.constant 5.000000e-01 : f32
    %9 = vector.broadcast %cst_6 : f32 to vector<8x128xf32>
    %10 = arith.mulf %9, %8 : vector<8x128xf32>
    %cst_7 = arith.constant 4.471500e-02 : f32
    %11 = vector.broadcast %cst_7 : f32 to vector<8x128xf32>
    %12 = arith.mulf %11, %8 : vector<8x128xf32>
    %13 = arith.mulf %12, %8 : vector<8x128xf32>
    %14 = arith.mulf %13, %8 : vector<8x128xf32>
    %15 = arith.addf %8, %14 : vector<8x128xf32>
    %cst_8 = arith.constant 0.797884583 : f32
    %16 = vector.broadcast %cst_8 : f32 to vector<8x128xf32>
    %17 = arith.mulf %16, %15 : vector<8x128xf32>
    %18 = math.tanh %17 : vector<8x128xf32>
    %cst_9 = arith.constant 1.000000e+00 : f32
    %19 = vector.broadcast %cst_9 : f32 to vector<8x128xf32>
    %20 = arith.addf %19, %18 : vector<8x128xf32>
    %21 = arith.mulf %10, %20 : vector<8x128xf32>
    %c0_10 = arith.constant 0 : index
    %c0_11 = arith.constant 0 : index
    %22 = vector.load %arg8[%c0_10, %c0_11] : memref<8x128xf32, #tpu.memory_space<vmem>>, vector<8x128xf32>
    %c0_12 = arith.constant 0 : index
    %c0_13 = arith.constant 0 : index
    %23 = vector.load %arg5[%c0_12, %c0_13] : memref<128x128xf32, #tpu.memory_space<vmem>>, vector<128x128xf32>
    %cst_14 = arith.constant dense<0.000000e+00> : vector<8x128xf32>
    %24 = tpu.matmul %21, %23, %cst_14 {dimension_numbers = #tpu.dot_dimension_numbers<[1], [0], [0], [1], [0, 0, 1, 1], [], []>} : vector<8x128xf32>, vector<128x128xf32>, vector<8x128xf32> -> vector<8x128xf32>
    %25 = arith.addf %22, %24 : vector<8x128xf32>
    %c0_15 = arith.constant 0 : index
    %c0_16 = arith.constant 0 : index
    %26 = vector.load %arg8[%c0_15, %c0_16] : memref<8x128xf32, #tpu.memory_space<vmem>>, vector<8x128xf32>
    tpu.vector_store %arg8[%c0_15, %c0_16], %25 {strides = array<i32>} : memref<8x128xf32, #tpu.memory_space<vmem>>, vector<8x128xf32>,
    %c0_i32_17 = arith.constant 0 : i32
    %27 = arith.cmpi eq, %arg1, %c0_i32_17 : i32
    %28 = arith.extui %27 : i1 to i32
    %c0_i32_18 = arith.constant 0 : i32
    %29 = arith.cmpi ne, %28, %c0_i32_18 : i32
    scf.if %29 {
      %c0_19 = arith.constant 0 : index
      %c0_20 = arith.constant 0 : index
      %30 = vector.load %arg8[%c0_19, %c0_20] : memref<8x128xf32, #tpu.memory_space<vmem>>, vector<8x128xf32>
      %c0_21 = arith.constant 0 : index
      %c0_22 = arith.constant 0 : index
      %31 = vector.load %arg6[%c0_21, %c0_22] : memref<1x128xf32, #tpu.memory_space<vmem>>, vector<1x128xf32>
      %32 = vector.broadcast %31 : vector<1x128xf32> to vector<8x128xf32>
      %33 = arith.addf %30, %32 : vector<8x128xf32>
      %c0_23 = arith.constant 0 : index
      %c0_24 = arith.constant 0 : index
      %34 = vector.load %arg7[%c0_23, %c0_24] : memref<8x128xf32, #tpu.memory_space<vmem>>, vector<8x128xf32>
      tpu.vector_store %arg7[%c0_23, %c0_24], %33 {strides = array<i32>} : memref<8x128xf32, #tpu.memory_space<vmem>>, vector<8x128xf32>,
    } else {
    }
    return
  }
  func.func @transform_0(%arg0: i32, %arg1: i32) -> (i32, i32) {
    %c0_i32 = arith.constant 0 : i32
    %c0_i32_0 = arith.constant 0 : i32
    return %arg0, %c0_i32 : i32, i32
  }
  func.func @transform_1(%arg0: i32, %arg1: i32) -> (i32, i32) {
    %c0_i32 = arith.constant 0 : i32
    %c0_i32_0 = arith.constant 0 : i32
    return %c0_i32, %arg1 : i32, i32
  }
  func.func @transform_2(%arg0: i32, %arg1: i32) -> (i32, i32) {
    %c0_i32 = arith.constant 0 : i32
    %c0_i32_0 = arith.constant 0 : i32
    return %c0_i32, %arg1 : i32, i32
  }
  func.func @transform_3(%arg0: i32, %arg1: i32) -> (i32, i32) {
    %c0_i32 = arith.constant 0 : i32
    %c0_i32_0 = arith.constant 0 : i32
    return %arg1, %c0_i32 : i32, i32
  }
  func.func @transform_4(%arg0: i32, %arg1: i32) -> (i32, i32) {
    %c0_i32 = arith.constant 0 : i32
    %c0_i32_0 = arith.constant 0 : i32
    %c0_i32_1 = arith.constant 0 : i32
    return %c0_i32, %c0_i32_0 : i32, i32
  }
  func.func @transform_5(%arg0: i32, %arg1: i32) -> (i32, i32) {
    %c0_i32 = arith.constant 0 : i32
    %c0_i32_0 = arith.constant 0 : i32
    return %arg0, %c0_i32 : i32, i32
  }
}

</mosaic_0001>

<bundles_post_ra>
// kernel: mlp_forward.1
= control target key start
LH: loop header
LB: loop body
LE: loop exit
PB: predicated region body
PF: predicated region fallthrough
CT: control target
= control target key end

     0   :  { %s587_s18 = smov 0   ;;  %s589_s19 = smov 0   ;;  %s733_s0 = inlined_call_operand.vmem [shape: f32[16,128], index: 0, kind: input, shape index: {}]   ;;  %s734_s1 = inlined_call_operand.vmem [shape: f32[128,128], index: 1, kind: input, shape index: {}]   ;;  %s735_s2 = inlined_call_operand.vmem [shape: f32[1,128], index: 2, kind: input, shape index: {}]   ;;  %s736_s3 = inlined_call_operand.vmem [shape: f32[128,128], index: 3, kind: input, shape index: {}]   ;;  %s737_s4 = inlined_call_operand.vmem [shape: f32[1,128], index: 4, kind: input, shape index: {}]   ;;  %s738_s5 = inlined_call_operand.vmem [shape: f32[16,128], index: 5, kind: output, shape index: {}]  }
   0x1   :  { %s591_s20 = smov 0  }
   0x2 LB: > { %s27_s21 = sadd.s32 1, %s551_s19  ;;  %p500_p0 = scmp.ge.s32.totalorder %s555_s20, 1  ;;  %s555_s20 = sphi %s591_s20, %s15_s20   ;;  %s551_s19 = sphi %s589_s19, %s740_s19   ;;  %s547_s18 = sphi %s587_s18, %s739_s18  }
   0x3   : > { %p29_p1 = scmp.ge.s32.totalorder %s27_s21, 2  ;;  %p226_p2 = scmp.lt.s32.totalorder %s555_s20, 3 }
   0x5   : > { %s742_s21 = smov (%p29_p1, %s27_s21), 0  ;;  %p227_p3 = pnand %p500_p0, %p226_p2 }
   0x6   : > { %p264_p4 = scmp.lt.s32.totalorder (!%p227_p3), %s547_s18, 1 }
   0x7   : > { %230 = sbr.rel (%p227_p3) target bundleno = 322 (0x142), region = 40 }
   0xc   : > { %v306_v0 = vld [vmem:[%s734_s1 + $0x78] sm:$0xff]  ;;  %v305_v1 = vld [vmem:[%s734_s1 + $0x70] sm:$0xff]  ;;  %v304_v2 = vld [vmem:[%s734_s1 + $0x68] sm:$0xff]  ;;  %s744_s18 = smov (!%p264_p4, %s547_s18), 1 }
   0xd   : > { %311 = vmatpush.msra.mxu0 %v306_v0  ;;  %v303_v3 = vld [vmem:[%s734_s1 + $0x60] sm:$0xff]  ;;  %v356_v4 = vld [vmem:[%s736_s3 + $0x78] sm:$0xff]  ;;  %v355_v5 = vld [vmem:[%s736_s3 + $0x70] sm:$0xff]  ;;  %s501_s10 = sshll.u32 %s744_s18, 3 }
   0xe   : > { %v302_v6 = vld [vmem:[%s734_s1 + $0x58] sm:$0xff]  ;;  %357 = vmatpush.msra.mxu1 %v356_v4  ;;  %v354_v7 = vld [vmem:[%s736_s3 + $0x68] sm:$0xff]  ;;  %v301_v8 = vld [vmem:[%s734_s1 + $0x50] sm:$0xff]  ;;  %s267_s17 = scalar_lea.vmem %s733_s0, %s501_s10  ;;  %s284_s9 = scalar_lea.vmem %s738_s5, %s501_s10 }
   0xf   : > { %312 = vmatpush.msra.mxu0 %v305_v1  ;;  %v353_v9 = vld [vmem:[%s736_s3 + $0x60] sm:$0xff]  ;;  %v300_v10 = vld [vmem:[%s734_s1 + $0x48] sm:$0xff]  ;;  %v298_v12 = vld [vmem:[%s734_s1 + $0x38] sm:$0xff] }
  0x10   : > { %358 = vmatpush.msra.mxu1 %v355_v5  ;;  %v299_v11 = vld [vmem:[%s734_s1 + $0x40] sm:$0xff]  ;;  %v297_v13 = vld [vmem:[%s734_s1 + $0x30] sm:$0xff]  ;;  %v296_v14 = vld [vmem:[%s734_s1 + $0x28] sm:$0xff] }
  0x11   : > { %313 = vmatpush.msra.mxu0 %v304_v2  ;;  %v295_v15 = vld [vmem:[%s734_s1 + $0x20] sm:$0xff]  ;;  %v294_v16 = vld [vmem:[%s734_s1 + $0x18] sm:$0xff]  ;;  %v293_v17 = vld [vmem:[%s734_s1 + $0x10] sm:$0xff] }
  0x12   : > { %359 = vmatpush.msra.mxu1 %v354_v7  ;;  %v292_v18 = vld [vmem:[%s734_s1 + $0x8] sm:$0xff]  ;;  %v291_v19 = vld [vmem:[%s734_s1] sm:$0xff]  ;;  %v352_v21 = vld [vmem:[%s736_s3 + $0x58] sm:$0xff] }
  0x13   : > { %314 = vmatpush.msra.mxu0 %v303_v3  ;;  %v290_v20 = vld [vmem:[%s267_s17] sm:$0xff]  ;;  %v351_v22 = vld [vmem:[%s736_s3 + $0x50] sm:$0xff]  ;;  %v350_v23 = vld [vmem:[%s736_s3 + $0x48] sm:$0xff] }
  0x14   : > { %360 = vmatpush.msra.mxu1 %v353_v9  ;;  %v349_v24 = vld [vmem:[%s736_s3 + $0x40] sm:$0xff]  ;;  %v348_v25 = vld [vmem:[%s736_s3 + $0x38] sm:$0xff]  ;;  %v347_v26 = vld [vmem:[%s736_s3 + $0x30] sm:$0xff] }
  0x15   : > { %315 = vmatpush.msra.mxu0 %v302_v6  ;;  %v346_v27 = vld [vmem:[%s736_s3 + $0x28] sm:$0xff]  ;;  %v345_v28 = vld [vmem:[%s736_s3 + $0x20] sm:$0xff]  ;;  %v344_v29 = vld [vmem:[%s736_s3 + $0x18] sm:$0xff] }
  0x16   : > { %361 = vmatpush.msra.mxu1 %v352_v21  ;;  %v343_v30 = vld [vmem:[%s736_s3 + $0x10] sm:$0xff]  ;;  %v342_v31 = vld [vmem:[%s736_s3 + $0x8] sm:$0xff]  ;;  %v341_v32 = vld [vmem:[%s736_s3] sm:$0xff] }
  0x17   : > { %316 = vmatpush.msra.mxu0 %v301_v8  ;;  %v529_v33 = vld [vmem:[%s735_s2] ss:$0 sm:$0xff] }
  0x18   : > { %362 = vmatpush.msra.mxu1 %v351_v22  ;;  %v530_v45 = vld [vmem:[%s737_s4] ss:$0 sm:$0xff] }
  0x19   : > { %317 = vmatpush.msra.mxu0 %v300_v10 }
  0x1a   : > { %363 = vmatpush.msra.mxu1 %v350_v23 }
  0x1b   : > { %318 = vmatpush.msra.mxu0 %v299_v11 }
  0x1c   : > { %364 = vmatpush.msra.mxu1 %v349_v24 }
  0x1d   : > { %319 = vmatpush.msra.mxu0 %v298_v12 }
  0x1e   : > { %365 = vmatpush.msra.mxu1 %v348_v25 }
  0x1f   : > { %320 = vmatpush.msra.mxu0 %v297_v13 }
  0x20   : > { %366 = vmatpush.msra.mxu1 %v347_v26 }
  0x21   : > { %321 = vmatpush.msra.mxu0 %v296_v14 }
  0x22   : > { %367 = vmatpush.msra.mxu1 %v346_v27 }
  0x23   : > { %322 = vmatpush.msra.mxu0 %v295_v15 }
  0x24   : > { %368 = vmatpush.msra.mxu1 %v345_v28 }
  0x25   : > { %323 = vmatpush.msra.mxu0 %v294_v16 }
  0x26   : > { %369 = vmatpush.msra.mxu1 %v344_v29 }
  0x27   : > { %324 = vmatpush.msra.mxu0 %v293_v17 }
  0x28   : > { %370 = vmatpush.msra.mxu1 %v343_v30 }
  0x29   : > { %325 = vmatpush.msra.mxu0 %v292_v18 }
  0x2a   : > { %371 = vmatpush.msra.mxu1 %v342_v31 }
  0x2b   : > { %326 = vmatpush.msra.mxu0 %v291_v19 }
  0x2c   : > { %327 = vmatmul.f32.vlgmr.msra.gmra.mxu0 %v290_v20  ;;  %372 = vmatpush.msra.mxu1 %v341_v32 }
  0xa9   : > { %v328_v34 = vpop.f32.mrf.mxu0 }
  0xaa   : > { %v329_v35 = vadd.f32 %v529_v33, %v328_v34 }
  0xac   : > { %v332_v36 = vmul.f32 0.044715, %v329_v35  ;;  %v331_v42 = vmul.f32 0.5, %v329_v35 }
  0xae   : > { %v333_v37 = vmul.f32 %v332_v36, %v329_v35 }
  0xb0   : > { %v334_v38 = vmul.f32 %v333_v37, %v329_v35 }
  0xb2   : > { %v335_v39 = vadd.f32 %v334_v38, %v329_v35 }
  0xb4   : > { %v336_v40 = vmul.f32 0.7978846, %v335_v39 }
  0xb6   : > { %531 = vtanh.f32 %v336_v40 }
  0xbc   : > { %v532_v41 = vpop.eup %531 }
  0xbd   : > { %v338_v43 = vadd.f32 1.0, %v532_v41 }
  0xbf   : > { %v339_v44 = vmul.f32 %v338_v43, %v331_v42 }
  0xc1   : > { %373 = vmatmul.f32.vlgmr.msra.gmra.mxu1 %v339_v44 }
 0x13e   : > { %v374_v46 = vpop.f32.mrf.mxu1 }
 0x13f   : > { %v387_v47 = vadd.f32 %v530_v45, %v374_v46 }
 0x141   : > { %388 = vst [vmem:[%s284_s9] sm:$0xff] %v387_v47 }
 0x142 PF: > { %s15_s20 = sadd.s32 1, %s555_s20   ;;  %s739_s18 = smov %s551_s19 }
 0x143   : > { %p12_p5 = scmp.ge.s32.totalorder %s15_s20, 4   ;;  %s740_s19 = smov %s742_s21 }
 0x145   :  { %14 = sbr.rel (!%p12_p5) target bundleno = 2 (0x2), region = 87 }

</bundles_post_ra>
